<compile_context>
chip_gen: v7x
topology: tpu7x:2x2x1
jax: 0.10.0
libtpu: 0.0.40
codegen_flags: <defaults>
</compile_context>

<pallas_src>
import functools

import jax
import jax.numpy as jnp
import numpy as np
from jax.experimental import pallas as pl
from jax.experimental.pallas import tpu as pltpu


# ---------------------------------------------------------------------------
# Kernels
# ---------------------------------------------------------------------------
def _ls_dense_kernel(x_ref, t_ref, out_ref, acc_ref, *, n_rows,
                     blocks_per_slice, confidence, smoothing):
    """Label-smoothing partial sum over one (TN, C) row tile, dense targets."""
    p = pl.program_id(0)          # parallel slice (megacore axis)
    i = pl.program_id(1)          # sequential reduction axis

    @pl.when(i == 0)
    def _init():
        acc_ref[...] = jnp.zeros_like(acc_ref)

    x = x_ref[...].astype(jnp.float32)       # cast AFTER load (native-dtype DMA)
    t = t_ref[...].astype(jnp.float32)
    tn, c = x.shape

    # Global row ids of this block; mask padded / duplicated (clamped) rows.
    row_idx = ((p * blocks_per_slice + i) * tn
               + jax.lax.broadcasted_iota(jnp.int32, (tn, 1), 0))
    row_mask = row_idx < n_rows
    x = jnp.where(row_mask, x, 0.0)          # keep exp/log finite on pad rows
    t = jnp.where(row_mask, t, 0.0)

    # log-sum-exp per row (numerically stable)
    row_max = jnp.max(x, axis=-1, keepdims=True)                        # (TN,1)
    lse = row_max + jnp.log(
        jnp.sum(jnp.exp(x - row_max), axis=-1, keepdims=True))          # (TN,1)

    # fused row reductions; never build logp / one-hot temporaries
    sum_t = jnp.sum(t, axis=-1, keepdims=True)
    sum_xt = jnp.sum(x * t, axis=-1, keepdims=True)
    sum_x = jnp.sum(x, axis=-1, keepdims=True)

    nll = lse * sum_t - sum_xt               # = sum_c(-logp * t)
    smooth = lse - sum_x * (1.0 / c)         # = mean_c(-logp)
    loss_row = confidence * nll + smoothing * smooth
    loss_row = jnp.where(row_mask, loss_row, 0.0)

    acc_ref[...] += loss_row                 # vector accumulate, no XLU per step

    @pl.when(i == pl.num_programs(1) - 1)
    def _finalize():
        out_ref[...] = jnp.sum(acc_ref[...], axis=0, keepdims=True)[None]


def _ls_labels_kernel(x_ref, tgt_ref, out_ref, acc_ref, *, n_rows,
                      blocks_per_slice, confidence, smoothing):
    """Label-smoothing / CE partial sum from integer labels (no dense target).

    With target = (1-s)*onehot + s/C:  sum_t = 1, sum_xt = (1-s)*x[label] +
    (s/C)*sum_x, so the dense-target math folds analytically. With
    confidence=1, smoothing=0 this is plain cross-entropy (eval mode).
    """
    p = pl.program_id(0)
    i = pl.program_id(1)

    @pl.when(i == 0)
    def _init():
        acc_ref[...] = jnp.zeros_like(acc_ref)

    x = x_ref[...].astype(jnp.float32)
    tn, c = x.shape

    row_idx = ((p * blocks_per_slice + i) * tn
               + jax.lax.broadcasted_iota(jnp.int32, (tn, 1), 0))
    row_mask = row_idx < n_rows
    x = jnp.where(row_mask, x, 0.0)

    row_max = jnp.max(x, axis=-1, keepdims=True)
    lse = row_max + jnp.log(
        jnp.sum(jnp.exp(x - row_max), axis=-1, keepdims=True))
    sum_x = jnp.sum(x, axis=-1, keepdims=True)

    # pick x[row, label[row]] without materializing a one-hot
    col = jax.lax.broadcasted_iota(jnp.int32, (tn, c), 1)
    x_tgt = jnp.sum(jnp.where(col == tgt_ref[...], x, 0.0),
                    axis=-1, keepdims=True)

    sum_xt = confidence * x_tgt + (smoothing / c) * sum_x
    nll = lse - sum_xt                         # sum_t == 1
    smooth = lse - sum_x * (1.0 / c)
    loss_row = confidence * nll + smoothing * smooth
    loss_row = jnp.where(row_mask, loss_row, 0.0)

    acc_ref[...] += loss_row

    @pl.when(i == pl.num_programs(1) - 1)
    def _finalize():
        out_ref[...] = jnp.sum(acc_ref[...], axis=0, keepdims=True)[None]


# ---------------------------------------------------------------------------
# Tile sizing, grid layout, VMEM config
# ---------------------------------------------------------------------------
_NUM_SLICES = 2   # parallel grid slices: engages both TCs on v7x, no-op on 1-TC


def _vmem_config():
    """(tile_budget_bytes, vmem_limit_bytes), generation-aware."""
    try:
        cap = getattr(pltpu.get_tpu_info(), "vmem_capacity_bytes", None)
    except Exception:
        cap = None
    if cap is None:
        cap = 64 * 1024 * 1024                     # conservative fallback (v7x)
    if cap >= 100 * 1024 * 1024:                   # v5e / v6e: 128 MiB VMEM
        return 48 * 1024 * 1024, 96 * 1024 * 1024
    return 20 * 1024 * 1024, 48 * 1024 * 1024      # v7x: 64 MiB per TC


def _sublane_mult(dtype):
    """Sublane packing multiple: 8 for 4-byte, 16 for bf16, 32 for 8-bit."""
    return max(8, 32 // jnp.dtype(dtype).itemsize)


def _choose_row_tile(n, io_bytes_per_row, tmp_bytes_per_row, budget, mult):
    """Largest row tile whose double-buffered I/O + f32 temps fit the budget."""
    per_row = 2 * io_bytes_per_row + tmp_bytes_per_row
    max_rows = max(mult, budget // max(1, per_row))
    if n <= max_rows:
        return n                                   # single tile == full dim
    return max(mult, (max_rows // mult) * mult)


def _grid_layout(n, tn):
    total_blocks = pl.cdiv(n, tn)
    p = 1 if total_blocks < 2 else _NUM_SLICES
    g = pl.cdiv(total_blocks, p)

    def row_map(pi, ii):
        # Clamp so a fully out-of-range trailing block (odd split) stays in
        # bounds; its rows are discarded by the in-kernel row mask.
        return (jnp.minimum(pi * g + ii, total_blocks - 1), 0)

    return p, g, row_map


# ---------------------------------------------------------------------------
# Wrappers
# ---------------------------------------------------------------------------
def label_smoothing_train_loss(x, target, smoothing, row_tile=None):
    """Dense soft-target path: x, target (..., C); returns scalar f32."""
    confidence = 1.0 - smoothing
    c = x.shape[-1]
    x2 = x.reshape(-1, c)                          # keep native dtype (bf16 OK)
    t2 = target.reshape(-1, c)
    n = x2.shape[0]

    budget, limit = _vmem_config()
    io_bytes = c * (x2.dtype.itemsize + t2.dtype.itemsize)
    tmp_bytes = 3 * 4 * c + 512                    # in-kernel f32 temps + acc row
    mult = _sublane_mult(x2.dtype)
    tn = (min(row_tile, n) if row_tile is not None
          else _choose_row_tile(n, io_bytes, tmp_bytes, budget, mult))

    p, g, row_map = _grid_layout(n, tn)
    kernel = functools.partial(_ls_dense_kernel, n_rows=n, blocks_per_slice=g,
                               confidence=float(confidence),
                               smoothing=float(smoothing))
    partials = pl.pallas_call(
        kernel,
        out_shape=jax.ShapeDtypeStruct((p, 1, 1), jnp.float32),
        grid=(p, g),
        in_specs=[pl.BlockSpec((tn, c), row_map),
                  pl.BlockSpec((tn, c), row_map)],
        out_specs=pl.BlockSpec((1, 1, 1), lambda pi, ii: (pi, 0, 0)),
        scratch_shapes=[pltpu.VMEM((tn, 1), jnp.float32)],
        compiler_params=pltpu.CompilerParams(
            dimension_semantics=("parallel", "arbitrary"),
            vmem_limit_bytes=limit),
        cost_estimate=pl.CostEstimate(
            flops=10 * n * c,
            transcendentals=n * c + n,
            bytes_accessed=n * io_bytes + 4 * p),
    )(x2, t2)
    return jnp.sum(partials) * (1.0 / n)


def _label_loss(x, labels, confidence, smoothing, row_tile=None):
    """Shared label-based path (train fast path & eval cross-entropy)."""
    c = x.shape[-1]
    x2 = x.reshape(-1, c)                          # native dtype
    tgt = labels.astype(jnp.int32).reshape(-1, 1)
    n = x2.shape[0]

    budget, limit = _vmem_config()
    # TODO(synk): (TN,1) i32 label block lane-pads to 128 in VMEM; a lane-dense
    # / scalar-prefetch layout would shave a small per-step DMA (modest win).
    io_bytes = c * x2.dtype.itemsize + 512
    tmp_bytes = 3 * 4 * c + 512
    mult = _sublane_mult(x2.dtype)
    tn = (min(row_tile, n) if row_tile is not None
          else _choose_row_tile(n, io_bytes, tmp_bytes, budget, mult))

    p, g, row_map = _grid_layout(n, tn)
    kernel = functools.partial(_ls_labels_kernel, n_rows=n, blocks_per_slice=g,
                               confidence=float(confidence),
                               smoothing=float(smoothing))
    partials = pl.pallas_call(
        kernel,
        out_shape=jax.ShapeDtypeStruct((p, 1, 1), jnp.float32),
        grid=(p, g),
        in_specs=[pl.BlockSpec((tn, c), row_map),
                  pl.BlockSpec((tn, 1), row_map)],
        out_specs=pl.BlockSpec((1, 1, 1), lambda pi, ii: (pi, 0, 0)),
        scratch_shapes=[pltpu.VMEM((tn, 1), jnp.float32)],
        compiler_params=pltpu.CompilerParams(
            dimension_semantics=("parallel", "arbitrary"),
            vmem_limit_bytes=limit),
        cost_estimate=pl.CostEstimate(
            flops=8 * n * c,
            transcendentals=n * c + n,
            bytes_accessed=n * (c * x2.dtype.itemsize + 4) + 4 * p),
    )(x2, tgt)
    return jnp.sum(partials) * (1.0 / n)


def label_smoothing_train_loss_from_labels(x, labels, smoothing, row_tile=None):
    """Fast path: integer labels; smoothed one-hot target synthesized in-kernel."""
    return _label_loss(x, labels, 1.0 - smoothing, smoothing, row_tile)


def cross_entropy_eval_loss(x, labels, row_tile=None):
    """Standard mean cross-entropy (eval mode)."""
    # TODO(synk): assumes (N, C) logits (class dim last), not PyTorch's
    # multi-dim NCHW cross_entropy layout; no ignore_index / class weights.
    return _label_loss(x, labels, 1.0, 0.0, row_tile)


class LabelSmoothing:
    """Mirror of the PyTorch LabelSmoothing module (forward only)."""

    def __init__(self, dic):
        smoothing = dic['smoothing']
        self.confidence = 1.0 - smoothing
        self.smoothing = smoothing

    def __call__(self, x, target, mode='train'):
        if mode == 'train':
            target = jnp.asarray(target)
            if jnp.issubdtype(target.dtype, jnp.integer):
                # Perf fast path: integer labels, no dense target HBM stream.
                return label_smoothing_train_loss_from_labels(
                    x, target, self.smoothing)
            return label_smoothing_train_loss(x, target, self.smoothing)
        else:
            return cross_entropy_eval_loss(x, target)


# ---------------------------------------------------------------------------
# Pure-JAX references (sanity check)
# ---------------------------------------------------------------------------
def _ls_train_ref(x, target, smoothing):
    confidence = 1.0 - smoothing
    xf = x.astype(jnp.float32)
    tf = target.astype(jnp.float32)
    logp = jax.nn.log_softmax(xf, axis=-1)
    nll = jnp.sum(-logp * tf, axis=-1)
    smooth = -jnp.mean(logp, axis=-1)
    return jnp.mean(confidence * nll + smoothing * smooth)


def _ce_ref(x, target):
    logp = jax.nn.log_softmax(x.astype(jnp.float32), axis=-1)
    picked = jnp.take_along_axis(
        logp, target.astype(jnp.int32).reshape(-1, 1), axis=-1)[:, 0]
    return -jnp.mean(picked)


# ---------------------------------------------------------------------------
if __name__ == "__main__":
    key = jax.random.PRNGKey(0)
    k1, k2, k3, k4 = jax.random.split(key, 4)

    smoothing = 0.1
    module = LabelSmoothing({'smoothing': smoothing})

    # --- train mode: small (8, 32) bf16 logits, dense smoothed one-hot target -
    n, c = 8, 32
    x = jax.random.normal(k1, (n, c), dtype=jnp.bfloat16)
    labels = jax.random.randint(k2, (n,), 0, c, dtype=jnp.int32)
    target = (jax.nn.one_hot(labels, c, dtype=jnp.float32) * (1.0 - smoothing)
              + smoothing / c)

    loss_train = module(x, target, mode='train')
    jax.block_until_ready(loss_train)
    ref_train = _ls_train_ref(x, target, smoothing)
    assert np.allclose(np.array(loss_train), np.array(ref_train),
                       rtol=1e-3, atol=1e-4), (loss_train, ref_train)

    # --- train fast path: integer labels (no dense target stream) ------------
    loss_fast = module(x, labels, mode='train')
    jax.block_until_ready(loss_fast)
    assert np.allclose(np.array(loss_fast), np.array(ref_train),
                       rtol=1e-3, atol=1e-4), (loss_fast, ref_train)

    # --- eval mode: integer targets ------------------------------------------
    loss_eval = module(x, labels, mode='eval')
    jax.block_until_ready(loss_eval)
    ref_eval = _ce_ref(x, labels)
    assert np.allclose(np.array(loss_eval), np.array(ref_eval),
                       rtol=1e-3, atol=1e-4), (loss_eval, ref_eval)

    # --- tiled + 2-slice parallel path with a ragged last tile ---------------
    n2, c2 = 1000, 256
    x2 = jax.random.normal(k3, (n2, c2), dtype=jnp.bfloat16)
    lab2 = jax.random.randint(k4, (n2,), 0, c2, dtype=jnp.int32)
    t2 = (jax.nn.one_hot(lab2, c2, dtype=jnp.float32) * (1.0 - smoothing)
          + smoothing / c2)

    loss2 = label_smoothing_train_loss(x2, t2, smoothing, row_tile=128)
    jax.block_until_ready(loss2)
    ref2 = _ls_train_ref(x2, t2, smoothing)
    assert np.allclose(np.array(loss2), np.array(ref2),
                       rtol=1e-3, atol=1e-4), (loss2, ref2)

    loss2f = label_smoothing_train_loss_from_labels(x2, lab2, smoothing,
                                                    row_tile=128)
    jax.block_until_ready(loss2f)
    assert np.allclose(np.array(loss2f), np.array(ref2),
                       rtol=1e-3, atol=1e-4), (loss2f, ref2)

    loss3 = cross_entropy_eval_loss(x2, lab2, row_tile=128)
    jax.block_until_ready(loss3)
    ref3 = _ce_ref(x2, lab2)
    assert np.allclose(np.array(loss3), np.array(ref3),
                       rtol=1e-3, atol=1e-4), (loss3, ref3)

    print("KERNEL_OK")
</pallas_src>

<mosaic_0001>
module attributes {stable_mosaic.version = 11 : i64} {
  func.func @_ls_dense_kernel(%arg0: i32, %arg1: i32, %arg2: memref<8x32xbf16, #tpu.memory_space<vmem>>, %arg3: memref<8x32xf32, #tpu.memory_space<vmem>>, %arg4: memref<1x1x1xf32, #tpu.memory_space<vmem>>, %arg5: memref<8x1xf32, #tpu.memory_space<vmem>>) attributes {dimension_semantics = [#tpu.dimension_semantics<parallel>, #tpu.dimension_semantics<arbitrary>], iteration_bounds = array<i64: 1, 1>, scalar_prefetch = 0 : i64, scratch_operands = 1 : i64, tpu.core_type = #tpu.core_type<tc>, window_params = [{transform_indices = @transform_0, window_bounds = array<i64: 8, 32>}, {transform_indices = @transform_1, window_bounds = array<i64: 8, 32>}, {transform_indices = @transform_2, window_bounds = array<i64: 1, 1, 1>}]} {
    %c0_i32 = arith.constant 0 : i32
    %0 = arith.cmpi eq, %arg1, %c0_i32 : i32
    %1 = arith.extui %0 : i1 to i32
    %c0_i32_0 = arith.constant 0 : i32
    %2 = arith.cmpi ne, %1, %c0_i32_0 : i32
    scf.if %2 {
      %cst_21 = arith.constant 0.000000e+00 : f32
      %56 = vector.broadcast %cst_21 : f32 to vector<8x1xf32>
      %c0_22 = arith.constant 0 : index
      %c0_23 = arith.constant 0 : index
      %57 = vector.load %arg5[%c0_22, %c0_23] : memref<8x1xf32, #tpu.memory_space<vmem>>, vector<8x1xf32>
      tpu.vector_store %arg5[%c0_22, %c0_23], %56 {strides = array<i32>} : memref<8x1xf32, #tpu.memory_space<vmem>>, vector<8x1xf32>,
    } else {
    }
    %c0 = arith.constant 0 : index
    %c0_1 = arith.constant 0 : index
    %3 = vector.load %arg2[%c0, %c0_1] : memref<8x32xbf16, #tpu.memory_space<vmem>>, vector<8x32xbf16>
    %4 = arith.extf %3 : vector<8x32xbf16> to vector<8x32xf32>
    %c0_2 = arith.constant 0 : index
    %c0_3 = arith.constant 0 : index
    %5 = vector.load %arg3[%c0_2, %c0_3] : memref<8x32xf32, #tpu.memory_space<vmem>>, vector<8x32xf32>
    %c1_i32 = arith.constant 1 : i32
    %6 = arith.muli %arg0, %c1_i32 : i32
    %7 = arith.addi %6, %arg1 : i32
    %c8_i32 = arith.constant 8 : i32
    %8 = arith.muli %7, %c8_i32 : i32
    %9 = tpu.iota {dimensions = array<i32: 0>} : vector<8x1xi32>
    %10 = vector.broadcast %8 : i32 to vector<8x1xi32>
    %11 = arith.addi %10, %9 : vector<8x1xi32>
    %c8_i32_4 = arith.constant 8 : i32
    %12 = vector.broadcast %c8_i32_4 : i32 to vector<8x1xi32>
    %13 = arith.cmpi slt, %11, %12 : vector<8x1xi32>
    %cst = arith.constant 0.000000e+00 : f32
    %14 = vector.shape_cast %13 : vector<8x1xi1> to vector<8x1xi1>
    %15 = vector.broadcast %14 : vector<8x1xi1> to vector<8x32xi1>
    %16 = vector.broadcast %cst : f32 to vector<8x32xf32>
    %17 = arith.select %15, %4, %16 : vector<8x32xi1>, vector<8x32xf32>
    %cst_5 = arith.constant 0.000000e+00 : f32
    %18 = vector.shape_cast %13 : vector<8x1xi1> to vector<8x1xi1>
    %19 = vector.broadcast %18 : vector<8x1xi1> to vector<8x32xi1>
    %20 = vector.broadcast %cst_5 : f32 to vector<8x32xf32>
    %21 = arith.select %19, %5, %20 : vector<8x32xi1>, vector<8x32xf32>
    %cst_6 = arith.constant dense<0xFF800000> : vector<8xf32>
    %22 = vector.multi_reduction <maximumf>, %17, %cst_6 [1] : vector<8x32xf32> to vector<8xf32>
    %23 = vector.shape_cast %22 : vector<8xf32> to vector<8x1xf32>
    %24 = vector.broadcast %23 : vector<8x1xf32> to vector<8x32xf32>
    %25 = arith.subf %17, %24 : vector<8x32xf32>
    %26 = math.exp %25 : vector<8x32xf32>
    %cst_7 = arith.constant dense<0.000000e+00> : vector<8xf32>
    %27 = vector.multi_reduction <add>, %26, %cst_7 [1] : vector<8x32xf32> to vector<8xf32>
    %28 = vector.shape_cast %27 : vector<8xf32> to vector<8x1xf32>
    %29 = math.log %28 : vector<8x1xf32>
    %30 = arith.addf %23, %29 : vector<8x1xf32>
    %cst_8 = arith.constant dense<0.000000e+00> : vector<8xf32>
    %31 = vector.multi_reduction <add>, %21, %cst_8 [1] : vector<8x32xf32> to vector<8xf32>
    %32 = vector.shape_cast %31 : vector<8xf32> to vector<8x1xf32>
    %33 = arith.mulf %17, %21 : vector<8x32xf32>
    %cst_9 = arith.constant dense<0.000000e+00> : vector<8xf32>
    %34 = vector.multi_reduction <add>, %33, %cst_9 [1] : vector<8x32xf32> to vector<8xf32>
    %35 = vector.shape_cast %34 : vector<8xf32> to vector<8x1xf32>
    %cst_10 = arith.constant dense<0.000000e+00> : vector<8xf32>
    %36 = vector.multi_reduction <add>, %17, %cst_10 [1] : vector<8x32xf32> to vector<8xf32>
    %37 = vector.shape_cast %36 : vector<8xf32> to vector<8x1xf32>
    %38 = arith.mulf %30, %32 : vector<8x1xf32>
    %39 = arith.subf %38, %35 : vector<8x1xf32>
    %cst_11 = arith.constant 3.125000e-02 : f32
    %40 = vector.broadcast %cst_11 : f32 to vector<8x1xf32>
    %41 = arith.mulf %37, %40 : vector<8x1xf32>
    %42 = arith.subf %30, %41 : vector<8x1xf32>
    %cst_12 = arith.constant 0.899999976 : f32
    %43 = vector.broadcast %cst_12 : f32 to vector<8x1xf32>
    %44 = arith.mulf %43, %39 : vector<8x1xf32>
    %cst_13 = arith.constant 1.000000e-01 : f32
    %45 = vector.broadcast %cst_13 : f32 to vector<8x1xf32>
    %46 = arith.mulf %45, %42 : vector<8x1xf32>
    %47 = arith.addf %44, %46 : vector<8x1xf32>
    %cst_14 = arith.constant 0.000000e+00 : f32
    %48 = vector.broadcast %cst_14 : f32 to vector<8x1xf32>
    %49 = arith.select %13, %47, %48 : vector<8x1xi1>, vector<8x1xf32>
    %c0_15 = arith.constant 0 : index
    %c0_16 = arith.constant 0 : index
    %50 = vector.load %arg5[%c0_15, %c0_16] : memref<8x1xf32, #tpu.memory_space<vmem>>, vector<8x1xf32>
    %51 = arith.addf %50, %49 : vector<8x1xf32>
    %c0_17 = arith.constant 0 : index
    %c0_18 = arith.constant 0 : index
    %52 = vector.load %arg5[%c0_17, %c0_18] : memref<8x1xf32, #tpu.memory_space<vmem>>, vector<8x1xf32>
    tpu.vector_store %arg5[%c0_17, %c0_18], %51 {strides = array<i32>} : memref<8x1xf32, #tpu.memory_space<vmem>>, vector<8x1xf32>,
    %c0_i32_19 = arith.constant 0 : i32
    %53 = arith.cmpi eq, %arg1, %c0_i32_19 : i32
    %54 = arith.extui %53 : i1 to i32
    %c0_i32_20 = arith.constant 0 : i32
    %55 = arith.cmpi ne, %54, %c0_i32_20 : i32
    scf.if %55 {
      %c0_21 = arith.constant 0 : index
      %c0_22 = arith.constant 0 : index
      %56 = vector.load %arg5[%c0_21, %c0_22] : memref<8x1xf32, #tpu.memory_space<vmem>>, vector<8x1xf32>
      %cst_23 = arith.constant dense<0.000000e+00> : vector<1xf32>
      %57 = vector.multi_reduction <add>, %56, %cst_23 [0] : vector<8x1xf32> to vector<1xf32>
      %58 = vector.shape_cast %57 : vector<1xf32> to vector<1x1xf32>
      %59 = vector.shape_cast %58 : vector<1x1xf32> to vector<1x1x1xf32>
      %c0_24 = arith.constant 0 : index
      %c0_25 = arith.constant 0 : index
      %c0_26 = arith.constant 0 : index
      %60 = vector.load %arg4[%c0_24, %c0_25, %c0_26] : memref<1x1x1xf32, #tpu.memory_space<vmem>>, vector<1x1x1xf32>
      tpu.vector_store %arg4[%c0_24, %c0_25, %c0_26], %59 {strides = array<i32>} : memref<1x1x1xf32, #tpu.memory_space<vmem>>, vector<1x1x1xf32>,
    } else {
    }
    return
  }
  func.func @transform_0(%arg0: i32, %arg1: i32) -> (i32, i32) {
    %c1_i32 = arith.constant 1 : i32
    %0 = arith.muli %arg0, %c1_i32 : i32
    %1 = arith.addi %0, %arg1 : i32
    %c0_i32 = arith.constant 0 : i32
    %2 = arith.minsi %1, %c0_i32 : i32
    %c0_i32_0 = arith.constant 0 : i32
    %c0_i32_1 = arith.constant 0 : i32
    return %2, %c0_i32_0 : i32, i32
  }
  func.func @transform_1(%arg0: i32, %arg1: i32) -> (i32, i32) {
    %c1_i32 = arith.constant 1 : i32
    %0 = arith.muli %arg0, %c1_i32 : i32
    %1 = arith.addi %0, %arg1 : i32
    %c0_i32 = arith.constant 0 : i32
    %2 = arith.minsi %1, %c0_i32 : i32
    %c0_i32_0 = arith.constant 0 : i32
    %c0_i32_1 = arith.constant 0 : i32
    return %2, %c0_i32_0 : i32, i32
  }
  func.func @transform_2(%arg0: i32, %arg1: i32) -> (i32, i32, i32) {
    %c0_i32 = arith.constant 0 : i32
    %c0_i32_0 = arith.constant 0 : i32
    %c0_i32_1 = arith.constant 0 : i32
    return %arg0, %c0_i32, %c0_i32_0 : i32, i32, i32
  }
}

</mosaic_0001>

<bundles_post_ra>
// kernel: tpu_custom_call.1
= control target key start
LH: loop header
LB: loop body
LE: loop exit
PB: predicated region body
PF: predicated region fallthrough
CT: control target
= control target key end

     0   :  { %7 = vsyncpa [#allocation4], 0  ;;  %s283_s0 = inlined_call_operand.hbm [shape: bf16[8,32], index: 0, kind: input, shape index: {}]   ;;  %s284_s1 = inlined_call_operand.hbm [shape: f32[8,32], index: 1, kind: input, shape index: {}]   ;;  %s285_s2 = inlined_call_operand.hbm [shape: f32[1,1,1], index: 2, kind: output, shape index: {}]  }
   0x1   :  { %8 = vsyncpa [#allocation7], 0 }
   0x2   :  { %9 = vsyncpa [#allocation5], 0  ;;  %s220_s9 = smov [#allocation3]   ;;  %s221_s11 = smov [#allocation6]  }
   0x3   :  { %s21_s10 = sshll.u32 %s220_s9, 4  ;;  %s36_s12 = sshll.u32 %s221_s11, 4  ;;  %s22_s10 = int_to_ptr.vmem [resolvable:$true] %s21_s10  ;;  %s37_s12 = int_to_ptr.vmem [resolvable:$true] %s36_s12 }
   0x4   :  { %s148_s15 = scalar_lea.hbm %s283_s0, 64 }
   0x5   :  { %p149_p0 = scmp.ne.s32.totalorder %s283_s0, %s148_s15  ;;  %p152_p1 = scmp.lt.u32.totalorder %s148_s15, %s283_s0 }
   0x7   :  { %p154_p2 = pnand %p152_p1, %p149_p0 }
   0x9   :  { %157 = shalt.err (!%p154_p2)
}
   0xa   :  { %s158_s20 = scalar_lea.vmem %s22_s10, 64  ;;  %p163_p4 = scmp.lt.s32.totalorder %s22_s10, %s22_s10 }
   0xb   :  { %p159_p3 = scmp.ne.s32.totalorder %s22_s10, %s158_s20  ;;  %p164_p5 = scmp.lt.s32.totalorder %s158_s20, %s158_s20 }
   0xd   :  { %p165_p6 = por %p164_p5, %p163_p4 }
   0xf   :  { %p166_p7 = pnand %p165_p6, %p159_p3 }
  0x11   :  { %169 = shalt.err (!%p166_p7)
}
  0x12   :  { %24 = dma.hbm_to_vmem [thread:$0]  %s283_s0, 64, %s22_s10, [#allocation4]  }
  0x13   :  { %s170_s25 = scalar_lea.hbm %s284_s1, 128 }
  0x14   :  { %p171_p8 = scmp.ne.s32.totalorder %s284_s1, %s170_s25  ;;  %p174_p9 = scmp.lt.u32.totalorder %s170_s25, %s284_s1 }
  0x16   :  { %p176_p10 = pnand %p174_p9, %p171_p8 }
  0x18   :  { %179 = shalt.err (!%p176_p10)
}
  0x19   :  { %s180_s30 = scalar_lea.vmem %s37_s12, 128  ;;  %p185_p12 = scmp.lt.s32.totalorder %s37_s12, %s37_s12 }
  0x1a   :  { %p181_p11 = scmp.ne.s32.totalorder %s37_s12, %s180_s30  ;;  %p186_p13 = scmp.lt.s32.totalorder %s180_s30, %s180_s30 }
  0x1c   :  { %p187_p0 = por %p186_p13, %p185_p12 }
  0x1e   :  { %p188_p1 = pnand %p187_p0, %p181_p11 }
  0x20   :  { %191 = shalt.err (!%p188_p1)
}
  0x21   :  { %39 = dma.hbm_to_vmem [thread:$0]  %s284_s1, 128, %s37_s12, [#allocation7]  }
  0x22   :  { %214 = dma.done.wait [#allocation4], 64  }
  0x23   :  { %215 = vsyncadd [#allocation4], 4294967232 }
  0x24   :  { %216 = dma.done.wait [#allocation7], 128  }
  0x25   :  { %217 = vsyncadd [#allocation7], 4294967168  ;;  %v58_v0 = vld [vmem:[#allocation3] sm:$0xf]  ;;  %vm72_vm0 = vcmask 261120   ;;  %v60_v3 = vld [vmem:[#allocation6] sm:$0xff] }
  0x26   :  { %v59_v1 = vunpack.c.l.bf16 %v58_v0  ;;  %v85_v4 = vsel %vm72_vm0, %v60_v3, 0.0  ;;  %vm56_vm1 = vcmask 7168   ;;  %v222_v13 = vmov 0.0   ;;  %s223_s1 = smov [#allocation8]  }
  0x27   :  { %86 = vadd.xlane.f32.xlu1 %v85_v4  ;;  %57 = vst.msk [vmem:[#allocation2] sm:$0xff] %vm56_vm1, %v222_v13  ;;  %s126_s4 = sshll.u32 %s223_s1, 4  ;;  %vm118_vm2 = vcmask 0   ;;  %s127_s4 = int_to_ptr.vmem [resolvable:$true] %s126_s4 }
  0x28   :  { %v73_v2 = vsel %vm72_vm0, %v59_v1, -inf  ;;  %v92_v5 = vsel %vm72_vm0, %v59_v1, 0.0  ;;  %v88_v9 = vmul.f32 %v60_v3, %v59_v1  ;;  %s192_s5 = scalar_lea.vmem %s127_s4, 16  ;;  %s196_s6 = scalar_lea.vmem %s127_s4, 32 }
  0x29   :  { %74 = vmax.xlane.f32.xlu0 %v73_v2  ;;  %p193_p2 = scmp.ne.s32.totalorder %s127_s4, %s192_s5  ;;  %p197_p3 = scmp.lt.s32.totalorder %s127_s4, %s127_s4 }
  0x2a   :  { %v89_v12 = vsel %vm72_vm0, %v88_v9, 0.0  ;;  %p198_p4 = scmp.lt.s32.totalorder %s196_s6, %s192_s5 }
  0x2b   :  { %93 = vadd.xlane.f32.xlu1 %v92_v5 }
  0x2c   :  { %p199_p5 = por %p198_p4, %p197_p3 }
  0x2e   :  { %v103_v27 = vld [vmem:[#allocation2] sm:$0xff]  ;;  %p200_p6 = pnand %p199_p5, %p193_p2 }
  0xb4   :  { %v87_v15 = vpop.xlane.xlu1 %86 }
  0xb6   :  { %v75_v6 = vpop.xlane.xlu0 %74 }
  0xb7   :  { %v76_v7 = vsub.f32 %v59_v1, %v75_v6 }
  0xb8   :  { %v94_v16 = vpop.xlane.xlu1 %93 }
  0xb9   :  { %v77_v8 = vmul.f32 1.442695, %v76_v7  ;;  %v97_v19 = vmul.f32 0.03125, %v94_v16 }
  0xbb   :  { %144 = vpow2.f32 %v77_v8 }
  0xc5   :  { %v145_v10 = vpop.eup %144 }
  0xc6   :  { %v79_v11 = vsel %vm72_vm0, %v145_v10, 0.0 }
  0xc7   :  { %80 = vadd.xlane.f32.xlu0 %v79_v11 }
  0xcb   :  { %90 = vadd.xlane.f32.xlu0 %v89_v12 }
 0x154   :  { %v81_v14 = vpop.xlane.xlu0 %80 }
 0x155   :  { %146 = vlog2.f32 %v81_v14 }
 0x158   :  { %v91_v21 = vpop.xlane.xlu0 %90 }
 0x15f   :  { %v147_v17 = vpop.eup %146 }
 0x160   :  { %v83_v18 = vmul.f32 0.6931472, %v147_v17 }
 0x162   :  { %v84_v20 = vadd.f32 %v83_v18, %v75_v6 }
 0x164   :  { %v95_v22 = vmul.f32 %v87_v15, %v84_v20  ;;  %v98_v23 = vsub.f32 %v84_v20, %v97_v19 }
 0x166   :  { %v96_v24 = vsub.f32 %v95_v22, %v91_v21  ;;  %v100_v25 = vmul.f32 0.1, %v98_v23 }
 0x168   :  { %v99_v26 = vmul.f32 0.9, %v96_v24 }
 0x16a   :  { %v101_v28 = vadd.f32 %v100_v25, %v99_v26 }
 0x16c   :  { %v104_v29 = vadd.f32 %v103_v27, %v101_v28 }
 0x16e   :  { %106 = vst.msk [vmem:[#allocation2] sm:$0xff] %vm56_vm1, %v104_v29 }
 0x175   :  { %v110_v30 = vld [vmem:[#allocation2] sm:$0xff] }
 0x176   :  { %v111_v31 = vsel %vm56_vm1, %v110_v30, 0.0 }
 0x177   :  { %v112_v32 = vrot.slane %v111_v31, 4 }
 0x179   :  { %v113_v33 = vadd.f32 %v112_v32, %v111_v31 }
 0x17b   :  { %v114_v34 = vrot.slane %v113_v33, 2 }
 0x17d   :  { %v115_v35 = vadd.f32 %v114_v34, %v113_v33 }
 0x17f   :  { %v116_v36 = vrot.slane %v115_v35, 1 }
 0x181   :  { %v117_v37 = vadd.f32 %v116_v36, %v115_v35 }
 0x183   :  { %119 = vst.msk [vmem:[#allocation8] sm:$0x1] %vm118_vm2, %v117_v37 }
 0x184   :  { %203 = shalt.err (!%p200_p6)
}
 0x185   :  { %s204_s9 = scalar_lea.hbm %s285_s2, 16 }
 0x186   :  { %p205_p7 = scmp.ne.s32.totalorder %s285_s2, %s204_s9  ;;  %p208_p8 = scmp.lt.u32.totalorder %s204_s9, %s285_s2 }
 0x188   :  { %p210_p9 = pnand %p208_p8, %p205_p7 }
 0x18a   :  { %213 = shalt.err (!%p210_p9)
}
 0x18b   :  { %129 = dma.vmem_to_hbm [thread:$0]  %s127_s4, 16, %s285_s2, [#allocation5]  }
 0x18c   :  { %218 = dma.done.wait [#allocation5], 16  }
 0x18d   :  { %219 = vsyncadd [#allocation5], 4294967280 }
 0x18e   :  { %133 = vsyncpa [#allocation4], 1 }
 0x18f   :  { %134 = vsyncpa [#allocation7], 1 }
 0x190   :  { %135 = vsyncpa [#allocation5], 1 }

</bundles_post_ra>
